<compile_context>
chip_gen: v6e
topology: v6e:2x2x1
jax: 0.10.0
libtpu: 0.0.40
codegen_flags: <defaults>
</compile_context>

<pallas_src>
import functools

import jax
import jax.numpy as jnp
from jax.experimental import pallas as pl
from jax.experimental.pallas import tpu as pltpu


# ---------------------------------------------------------------------------
# Fused single-pass kernel (fast path: whole (C, HW) plane resident in VMEM).
# Grid (B,): x is read from HBM once, written once.
# ---------------------------------------------------------------------------
def _fused_kernel(x_ref, w1_ref, b1_ref, w2_ref, b2_ref, wc_ref, o_ref, *, inv_hw):
    x = x_ref[0]                                             # (C, HW) native dtype
    xf = x.astype(jnp.float32)

    # Channel gate: GAP -> Linear -> ReLU -> Linear -> sigmoid   (column-vector MLP)
    gap = jnp.sum(xf, axis=1, keepdims=True) * inv_hw        # (C, 1) f32, true H*W mean
    h = jnp.dot(w1_ref[...], gap, preferred_element_type=jnp.float32) + b1_ref[...]
    h = jnp.maximum(h, 0.0)
    z = jax.nn.sigmoid(
        jnp.dot(w2_ref[...], h, preferred_element_type=jnp.float32) + b2_ref[...])  # (C, 1)

    # Spatial gate: 1x1 conv as an M=1 matmul (bf16 inputs stay bf16 on the MXU, f32 accumulate).
    s = jax.nn.sigmoid(
        jnp.dot(wc_ref[...].astype(x.dtype), x, preferred_element_type=jnp.float32))  # (1, HW)

    gate = s + z                                             # (1,HW)+(C,1) -> (C, HW) f32
    if o_ref.dtype == jnp.float32:
        o_ref[0] = xf * gate
    else:
        # keep the elementwise multiply + store in the narrow dtype (bf16 VPU on v6e/v7x)
        o_ref[0] = (x * gate.astype(x.dtype)).astype(o_ref.dtype)


# ---------------------------------------------------------------------------
# Pass 1 (tiled path): z = sigmoid(W2 @ relu(W1 @ mean_hw(x) + b1) + b2)  -> (B, C, 1) f32
# Grid (B, n_chunks): batch parallel, HW-chunk axis is the reduction ("arbitrary", last).
# ---------------------------------------------------------------------------
def _channel_gate_kernel(x_ref, w1_ref, b1_ref, w2_ref, b2_ref, z_ref, *, inv_hw):
    k = pl.program_id(1)

    @pl.when(k == 0)
    def _init():
        z_ref[...] = jnp.zeros_like(z_ref)

    x = x_ref[0].astype(jnp.float32)                        # (C, T_HW)
    z_ref[0] += jnp.sum(x, axis=1, keepdims=True)           # accumulate spatial sum -> (C, 1)

    @pl.when(k == pl.num_programs(1) - 1)
    def _finalize():
        mean = z_ref[0] * inv_hw                            # divides by the TRUE H*W
        h = jnp.dot(w1_ref[...], mean,
                    preferred_element_type=jnp.float32) + b1_ref[...]   # (Cr, 1)
        h = jnp.maximum(h, 0.0)
        z = jnp.dot(w2_ref[...], h,
                    preferred_element_type=jnp.float32) + b2_ref[...]   # (C, 1)
        z_ref[0] = jax.nn.sigmoid(z)


# ---------------------------------------------------------------------------
# Pass 2 (tiled path): out = x * (sigmoid(wc @ x) + z)
# Grid (B, n_chunks): fully parallel, lane-dense output blocks (1, C, T_HW).
# ---------------------------------------------------------------------------
def _apply_kernel(x_ref, wc_ref, z_ref, o_ref):
    x = x_ref[0]                                            # (C, T_HW) native dtype
    s = jax.nn.sigmoid(
        jnp.dot(wc_ref[...].astype(x.dtype), x, preferred_element_type=jnp.float32))  # (1, T_HW)
    gate = s + z_ref[0]                                     # (1,T)+(C,1) -> (C, T_HW) f32
    if o_ref.dtype == jnp.float32:
        o_ref[0] = x.astype(jnp.float32) * gate
    else:
        o_ref[0] = (x * gate.astype(x.dtype)).astype(o_ref.dtype)


def _choose_chunk(hw128, c, itemsize, target_bytes):
    """Given the 128-padded spatial extent, pick (chunk, padded_hw) with chunk a multiple of 128,
    chunk*C*itemsize <= target_bytes, and chunk dividing padded_hw."""
    cap = max(128, (target_bytes // max(1, c * itemsize)) // 128 * 128)
    if hw128 <= cap:
        return hw128, hw128                     # single chunk covers the (padded) plane
    # Prefer the largest 128-multiple divisor of the 128-padded extent (minimal padding).
    best = 128
    cand = 128
    while cand <= cap:
        if hw128 % cand == 0:
            best = cand
        cand += 128
    if 4 * best >= cap:
        return best, hw128
    # Pathological extent (only tiny divisors): pad further so chunks stay near the cap.
    return cap, pl.cdiv(hw128, cap) * cap


def scse_block(x_nchw, w1, b1, w2, b2, w_conv, *, hw_chunk=None,
               fused_plane_bytes=2 << 20, chunk_target_bytes=2 << 20):
    """x_nchw: (B, C, H, W).  w1: (Cr, C), b1: (Cr,), w2: (C, Cr), b2: (C,), w_conv: (1, C, 1, 1).
    Returns (B, C, H, W) with the same dtype as x_nchw."""
    B, C, H, W = x_nchw.shape
    Cr = w1.shape[0]
    HW = H * W
    in_dtype = x_nchw.dtype
    itemsize = jnp.dtype(in_dtype).itemsize

    x3 = x_nchw.reshape(B, C, HW)       # native layout: no transpose, just a reshape

    # Weights in native PyTorch layouts; biases as column vectors; f32 for the tiny MLP.
    w1f = w1.astype(jnp.float32)                    # (Cr, C)
    b1c = b1.reshape(Cr, 1).astype(jnp.float32)     # (Cr, 1)
    w2f = w2.astype(jnp.float32)                    # (C, Cr)
    b2c = b2.reshape(C, 1).astype(jnp.float32)      # (C, 1)
    wcr = w_conv.reshape(1, C).astype(jnp.float32)  # (1, C)  1x1-conv weight as a row

    plane_bytes = C * HW * itemsize
    weight_bytes = 4 * (2 * C * Cr + C + Cr + C)

    # ---------------- fused single-pass fast path ----------------
    if hw_chunk is None and plane_bytes <= fused_plane_bytes:
        cost = pl.CostEstimate(
            flops=5 * B * C * HW + 4 * B * C * Cr,
            transcendentals=B * (HW + C),
            bytes_accessed=2 * B * C * HW * itemsize + weight_bytes,
        )
        out = pl.pallas_call(
            functools.partial(_fused_kernel, inv_hw=1.0 / HW),
            out_shape=jax.ShapeDtypeStruct((B, C, HW), in_dtype),
            grid_spec=pltpu.PrefetchScalarGridSpec(
                num_scalar_prefetch=0,
                grid=(B,),
                in_specs=[
                    pl.BlockSpec((1, C, HW), lambda b: (b, 0, 0)),   # whole image plane
                    pl.BlockSpec((Cr, C), lambda b: (0, 0)),         # W1
                    pl.BlockSpec((Cr, 1), lambda b: (0, 0)),         # b1 (column)
                    pl.BlockSpec((C, Cr), lambda b: (0, 0)),         # W2
                    pl.BlockSpec((C, 1), lambda b: (0, 0)),          # b2 (column)
                    pl.BlockSpec((1, C), lambda b: (0, 0)),          # conv 1x1 weight (row)
                ],
                out_specs=pl.BlockSpec((1, C, HW), lambda b: (b, 0, 0)),
            ),
            compiler_params=pltpu.CompilerParams(
                dimension_semantics=("parallel",)),
            cost_estimate=cost,
        )(x3, w1f, b1c, w2f, b2c, wcr)
        return out.reshape(B, C, H, W)

    # ---------------- tiled two-pass path (large planes) ----------------
    # Pad HW up to the chunk grid (zeros); GAP uses the true H*W so padding never changes the math.
    if hw_chunk is None:
        hw128 = pl.cdiv(HW, 128) * 128
        hw_chunk, HWp = _choose_chunk(hw128, C, itemsize, chunk_target_bytes)
    else:
        HWp = pl.cdiv(HW, hw_chunk) * hw_chunk
    if HWp != HW:
        x3 = jnp.pad(x3, ((0, 0), (0, 0), (0, HWp - HW)))
    n_chunks = HWp // hw_chunk

    # ---- pass 1: channel gate z (B, C, 1) f32 ----
    cost1 = pl.CostEstimate(
        flops=B * C * HWp + 4 * B * C * Cr,
        transcendentals=B * C,
        bytes_accessed=B * C * HWp * itemsize + B * C * 4 + weight_bytes,
    )
    z = pl.pallas_call(
        functools.partial(_channel_gate_kernel, inv_hw=1.0 / HW),
        out_shape=jax.ShapeDtypeStruct((B, C, 1), jnp.float32),
        grid_spec=pltpu.PrefetchScalarGridSpec(
            num_scalar_prefetch=0,
            grid=(B, n_chunks),
            in_specs=[
                pl.BlockSpec((1, C, hw_chunk), lambda b, k: (b, 0, k)),  # x chunk
                pl.BlockSpec((Cr, C), lambda b, k: (0, 0)),              # W1
                pl.BlockSpec((Cr, 1), lambda b, k: (0, 0)),              # b1 (column)
                pl.BlockSpec((C, Cr), lambda b, k: (0, 0)),              # W2
                pl.BlockSpec((C, 1), lambda b, k: (0, 0)),               # b2 (column)
            ],
            out_specs=pl.BlockSpec((1, C, 1), lambda b, k: (b, 0, 0)),   # resident accumulator
        ),
        compiler_params=pltpu.CompilerParams(
            dimension_semantics=("parallel", "arbitrary")),
        cost_estimate=cost1,
    )(x3, w1f, b1c, w2f, b2c)

    # ---- pass 2: out = x * (sigmoid(wc @ x) + z) ----
    cost2 = pl.CostEstimate(
        flops=4 * B * C * HWp,
        transcendentals=B * (HWp + C),
        bytes_accessed=2 * B * C * HWp * itemsize + B * C * 4 + C * 4,
    )
    out = pl.pallas_call(
        _apply_kernel,
        out_shape=jax.ShapeDtypeStruct((B, C, HWp), in_dtype),
        grid_spec=pltpu.PrefetchScalarGridSpec(
            num_scalar_prefetch=0,
            grid=(B, n_chunks),
            in_specs=[
                pl.BlockSpec((1, C, hw_chunk), lambda b, k: (b, 0, k)),  # x chunk
                pl.BlockSpec((1, C), lambda b, k: (0, 0)),               # conv 1x1 weight
                pl.BlockSpec((1, C, 1), lambda b, k: (b, 0, 0)),         # channel gate z
            ],
            out_specs=pl.BlockSpec((1, C, hw_chunk), lambda b, k: (b, 0, k)),
        ),
        compiler_params=pltpu.CompilerParams(
            dimension_semantics=("parallel", "parallel")),
        cost_estimate=cost2,
    )(x3, wcr, z)

    if HWp != HW:
        out = out[:, :, :HW]
    return out.reshape(B, C, H, W)


def _reference(x, w1, b1, w2, b2, w_conv):
    # Pure-JAX reference mirroring the PyTorch module (NCHW).
    B, C, H, W = x.shape
    xf = x.astype(jnp.float32)
    gap = jnp.mean(xf, axis=(2, 3))                                  # (B, C)
    h = jnp.maximum(gap @ w1.T + b1, 0.0)                            # (B, Cr)
    z = jax.nn.sigmoid(h @ w2.T + b2)                                # (B, C)
    wc = w_conv.reshape(1, C, 1, 1)
    s = jax.nn.sigmoid(jnp.sum(xf * wc, axis=1, keepdims=True))      # (B, 1, H, W)
    return (s * xf + z[:, :, None, None] * xf).astype(x.dtype)


if __name__ == "__main__":
    B, C, H, W = 2, 64, 16, 16
    reduction = 16
    Cr = C // reduction

    key = jax.random.PRNGKey(0)
    kx, k1, k2, k3, k4, k5, kx2 = jax.random.split(key, 7)

    x = jax.random.normal(kx, (B, C, H, W), dtype=jnp.float32)
    w1 = jax.random.normal(k1, (Cr, C), dtype=jnp.float32) * 0.1     # Linear(C -> Cr)
    b1 = jax.random.normal(k2, (Cr,), dtype=jnp.float32) * 0.1
    w2 = jax.random.normal(k3, (C, Cr), dtype=jnp.float32) * 0.1     # Linear(Cr -> C)
    b2 = jax.random.normal(k4, (C,), dtype=jnp.float32) * 0.1
    w_conv = jax.random.normal(k5, (1, C, 1, 1), dtype=jnp.float32) * 0.1  # Conv2d(C,1,1,bias=False)

    ref = _reference(x, w1, b1, w2, b2, w_conv)

    # 1) Default dispatch: fused single-pass fast path (plane fits VMEM).
    out = jax.block_until_ready(scse_block(x, w1, b1, w2, b2, w_conv))
    assert out.shape == (B, C, H, W)
    assert out.dtype == x.dtype
    assert jnp.allclose(out, ref, atol=1e-5, rtol=1e-5)

    # 2) Forced spatial tiling (exercises the two-pass GAP accumulator / finalize path).
    out_tiled = jax.block_until_ready(
        scse_block(x, w1, b1, w2, b2, w_conv, hw_chunk=128))
    assert jnp.allclose(out_tiled, ref, atol=1e-5, rtol=1e-5)

    # 3) HW not a multiple of 128 -> padded tiled path (padding sliced off, GAP uses true H*W).
    Hb, Wb = 20, 20
    xb = jax.random.normal(kx2, (B, C, Hb, Wb), dtype=jnp.float32)
    refb = _reference(xb, w1, b1, w2, b2, w_conv)
    out_pad = jax.block_until_ready(
        scse_block(xb, w1, b1, w2, b2, w_conv, hw_chunk=128))
    assert out_pad.shape == (B, C, Hb, Wb)
    assert jnp.allclose(out_pad, refb, atol=1e-5, rtol=1e-5)

    # 4) Two-pass path with automatic chunk selection (fused path disabled).
    out_auto = jax.block_until_ready(
        scse_block(xb, w1, b1, w2, b2, w_conv, fused_plane_bytes=0))
    assert jnp.allclose(out_auto, refb, atol=1e-5, rtol=1e-5)

    # 5) bf16 input: bf16-native MXU matmul + bf16 elementwise/store path (fused kernel).
    xh = x.astype(jnp.bfloat16)
    refh = _reference(xh, w1, b1, w2, b2, w_conv)
    out_h = jax.block_until_ready(scse_block(xh, w1, b1, w2, b2, w_conv))
    assert out_h.dtype == jnp.bfloat16
    assert jnp.allclose(out_h.astype(jnp.float32), refh.astype(jnp.float32),
                        atol=5e-2, rtol=5e-2)

    print("KERNEL_OK")
</pallas_src>

<mosaic_0001>
module attributes {stable_mosaic.version = 11 : i64} {
  func.func @_fused_kernel(%arg0: i32, %arg1: memref<1x64x256xf32, #tpu.memory_space<vmem>>, %arg2: memref<4x64xf32, #tpu.memory_space<vmem>>, %arg3: memref<4x1xf32, #tpu.memory_space<vmem>>, %arg4: memref<64x4xf32, #tpu.memory_space<vmem>>, %arg5: memref<64x1xf32, #tpu.memory_space<vmem>>, %arg6: memref<1x64xf32, #tpu.memory_space<vmem>>, %arg7: memref<1x64x256xf32, #tpu.memory_space<vmem>>) attributes {dimension_semantics = [#tpu.dimension_semantics<parallel>], iteration_bounds = array<i64: 2>, scalar_prefetch = 0 : i64, scratch_operands = 0 : i64, tpu.core_type = #tpu.core_type<tc>, window_params = [{transform_indices = @transform_0, window_bounds = array<i64: 1, 64, 256>}, {pipeline_mode = #tpu.pipeline_mode<synchronous>, transform_indices = @transform_1, window_bounds = array<i64: 4, 64>}, {pipeline_mode = #tpu.pipeline_mode<synchronous>, transform_indices = @transform_2, window_bounds = array<i64: 4, 1>}, {pipeline_mode = #tpu.pipeline_mode<synchronous>, transform_indices = @transform_3, window_bounds = array<i64: 64, 4>}, {pipeline_mode = #tpu.pipeline_mode<synchronous>, transform_indices = @transform_4, window_bounds = array<i64: 64, 1>}, {pipeline_mode = #tpu.pipeline_mode<synchronous>, transform_indices = @transform_5, window_bounds = array<i64: 1, 64>}, {transform_indices = @transform_6, window_bounds = array<i64: 1, 64, 256>}]} {
    %c0 = arith.constant 0 : index
    %c0_0 = arith.constant 0 : index
    %c0_1 = arith.constant 0 : index
    %0 = vector.load %arg1[%c0, %c0_0, %c0_1] : memref<1x64x256xf32, #tpu.memory_space<vmem>>, vector<1x64x256xf32>
    %1 = vector.shape_cast %0 : vector<1x64x256xf32> to vector<64x256xf32>
    %cst = arith.constant dense<0.000000e+00> : vector<64xf32>
    %2 = vector.multi_reduction <add>, %1, %cst [1] : vector<64x256xf32> to vector<64xf32>
    %3 = vector.shape_cast %2 : vector<64xf32> to vector<64x1xf32>
    %cst_2 = arith.constant 3.906250e-03 : f32
    %4 = vector.broadcast %cst_2 : f32 to vector<64x1xf32>
    %5 = arith.mulf %3, %4 : vector<64x1xf32>
    %c0_3 = arith.constant 0 : index
    %c0_4 = arith.constant 0 : index
    %6 = vector.load %arg2[%c0_3, %c0_4] : memref<4x64xf32, #tpu.memory_space<vmem>>, vector<4x64xf32>
    %cst_5 = arith.constant dense<0.000000e+00> : vector<4x1xf32>
    %7 = tpu.matmul %6, %5, %cst_5 {dimension_numbers = #tpu.dot_dimension_numbers<[1], [0], [0], [1], [0, 0, 1, 1], [], []>} : vector<4x64xf32>, vector<64x1xf32>, vector<4x1xf32> -> vector<4x1xf32>
    %c0_6 = arith.constant 0 : index
    %c0_7 = arith.constant 0 : index
    %8 = vector.load %arg3[%c0_6, %c0_7] : memref<4x1xf32, #tpu.memory_space<vmem>>, vector<4x1xf32>
    %9 = arith.addf %7, %8 : vector<4x1xf32>
    %cst_8 = arith.constant 0.000000e+00 : f32
    %10 = vector.broadcast %cst_8 : f32 to vector<4x1xf32>
    %11 = arith.maximumf %9, %10 : vector<4x1xf32>
    %c0_9 = arith.constant 0 : index
    %c0_10 = arith.constant 0 : index
    %12 = vector.load %arg4[%c0_9, %c0_10] : memref<64x4xf32, #tpu.memory_space<vmem>>, vector<64x4xf32>
    %cst_11 = arith.constant dense<0.000000e+00> : vector<64x1xf32>
    %13 = tpu.matmul %12, %11, %cst_11 {dimension_numbers = #tpu.dot_dimension_numbers<[1], [0], [0], [1], [0, 0, 1, 1], [], []>} : vector<64x4xf32>, vector<4x1xf32>, vector<64x1xf32> -> vector<64x1xf32>
    %c0_12 = arith.constant 0 : index
    %c0_13 = arith.constant 0 : index
    %14 = vector.load %arg5[%c0_12, %c0_13] : memref<64x1xf32, #tpu.memory_space<vmem>>, vector<64x1xf32>
    %15 = arith.addf %13, %14 : vector<64x1xf32>
    %16 = arith.negf %15 : vector<64x1xf32>
    %17 = math.exp %16 : vector<64x1xf32>
    %cst_14 = arith.constant 1.000000e+00 : f32
    %18 = vector.broadcast %cst_14 : f32 to vector<64x1xf32>
    %19 = arith.addf %18, %17 : vector<64x1xf32>
    %20 = arith.divf %18, %19 : vector<64x1xf32>
    %c0_15 = arith.constant 0 : index
    %c0_16 = arith.constant 0 : index
    %21 = vector.load %arg6[%c0_15, %c0_16] : memref<1x64xf32, #tpu.memory_space<vmem>>, vector<1x64xf32>
    %cst_17 = arith.constant dense<0.000000e+00> : vector<1x256xf32>
    %22 = tpu.matmul %21, %1, %cst_17 {dimension_numbers = #tpu.dot_dimension_numbers<[1], [0], [0], [1], [0, 0, 1, 1], [], []>} : vector<1x64xf32>, vector<64x256xf32>, vector<1x256xf32> -> vector<1x256xf32>
    %23 = arith.negf %22 : vector<1x256xf32>
    %24 = math.exp %23 : vector<1x256xf32>
    %cst_18 = arith.constant 1.000000e+00 : f32
    %25 = vector.broadcast %cst_18 : f32 to vector<1x256xf32>
    %26 = arith.addf %25, %24 : vector<1x256xf32>
    %27 = arith.divf %25, %26 : vector<1x256xf32>
    %28 = vector.broadcast %27 : vector<1x256xf32> to vector<64x256xf32>
    %29 = vector.broadcast %20 : vector<64x1xf32> to vector<64x256xf32>
    %30 = arith.addf %28, %29 : vector<64x256xf32>
    %31 = arith.mulf %1, %30 : vector<64x256xf32>
    %c0_19 = arith.constant 0 : index
    %c0_20 = arith.constant 0 : index
    %c0_21 = arith.constant 0 : index
    %32 = vector.load %arg7[%c0_19, %c0_20, %c0_21] : memref<1x64x256xf32, #tpu.memory_space<vmem>>, vector<1x64x256xf32>
    %33 = vector.shape_cast %32 : vector<1x64x256xf32> to vector<64x256xf32>
    %34 = vector.shape_cast %31 : vector<64x256xf32> to vector<1x64x256xf32>
    tpu.vector_store %arg7[%c0_19, %c0_20, %c0_21], %34 {strides = array<i32>} : memref<1x64x256xf32, #tpu.memory_space<vmem>>, vector<1x64x256xf32>,
    return
  }
  func.func @transform_0(%arg0: i32) -> (i32, i32, i32) {
    %c0_i32 = arith.constant 0 : i32
    %c0_i32_0 = arith.constant 0 : i32
    %c0_i32_1 = arith.constant 0 : i32
    return %arg0, %c0_i32, %c0_i32_0 : i32, i32, i32
  }
  func.func @transform_1(%arg0: i32) -> (i32, i32) {
    %c0_i32 = arith.constant 0 : i32
    %c0_i32_0 = arith.constant 0 : i32
    %c0_i32_1 = arith.constant 0 : i32
    return %c0_i32, %c0_i32_0 : i32, i32
  }
  func.func @transform_2(%arg0: i32) -> (i32, i32) {
    %c0_i32 = arith.constant 0 : i32
    %c0_i32_0 = arith.constant 0 : i32
    %c0_i32_1 = arith.constant 0 : i32
    return %c0_i32, %c0_i32_0 : i32, i32
  }
  func.func @transform_3(%arg0: i32) -> (i32, i32) {
    %c0_i32 = arith.constant 0 : i32
    %c0_i32_0 = arith.constant 0 : i32
    %c0_i32_1 = arith.constant 0 : i32
    return %c0_i32, %c0_i32_0 : i32, i32
  }
  func.func @transform_4(%arg0: i32) -> (i32, i32) {
    %c0_i32 = arith.constant 0 : i32
    %c0_i32_0 = arith.constant 0 : i32
    %c0_i32_1 = arith.constant 0 : i32
    return %c0_i32, %c0_i32_0 : i32, i32
  }
  func.func @transform_5(%arg0: i32) -> (i32, i32) {
    %c0_i32 = arith.constant 0 : i32
    %c0_i32_0 = arith.constant 0 : i32
    %c0_i32_1 = arith.constant 0 : i32
    return %c0_i32, %c0_i32_0 : i32, i32
  }
  func.func @transform_6(%arg0: i32) -> (i32, i32, i32) {
    %c0_i32 = arith.constant 0 : i32
    %c0_i32_0 = arith.constant 0 : i32
    %c0_i32_1 = arith.constant 0 : i32
    return %arg0, %c0_i32, %c0_i32_0 : i32, i32, i32
  }
}

</mosaic_0001>

<bundles_post_ra>
// kernel: tpu_custom_call.1
= control target key start
LH: loop header
LB: loop body
LE: loop exit
PB: predicated region body
PF: predicated region fallthrough
CT: control target
= control target key end

     0   :  { %11 = vsyncpa [#allocation3], 0  ;;  %s1518_s0 = inlined_call_operand.hbm [shape: f32[2,64,256], index: 0, kind: input, shape index: {}]   ;;  %s1519_s1 = inlined_call_operand.vmem [shape: f32[4,64], index: 1, kind: input, shape index: {}]   ;;  %s1520_s2 = inlined_call_operand.vmem [shape: f32[4,1], index: 2, kind: input, shape index: {}]   ;;  %s1521_s3 = inlined_call_operand.vmem [shape: f32[64,4], index: 3, kind: input, shape index: {}]   ;;  %s1522_s4 = inlined_call_operand.vmem [shape: f32[64,1], index: 4, kind: input, shape index: {}]   ;;  %s1523_s5 = inlined_call_operand.vmem [shape: f32[1,64], index: 5, kind: input, shape index: {}]   ;;  %s1524_s6 = inlined_call_operand.hbm [shape: f32[2,64,256], index: 6, kind: output, shape index: {}]  }
   0x1   :  { %13 = vsyncpa [#allocation3 + $0x1], 0 }
   0x2   :  { %14 = vsyncpa [#allocation4], 0 }
   0x3   :  { %16 = vsyncpa [#allocation4 + $0x1], 0  ;;  %s1184_s21 = smov 0   ;;  %s1186_s22 = smov 0  }
   0x4   :  { %s1188_s23 = smov 0   ;;  %s1190_s24 = smov 0  }
   0x5 LB: > { %s1205_s25 = sadd.s32 4294967295, %s1138_s24   ;;  %s863_s26 = sadd.s32 4294967294, %s1138_s24   ;;  %s1138_s24 = sphi %s1190_s24, %s1539_s24   ;;  %s1134_s23 = sphi %s1188_s23, %s1538_s23   ;;  %s1130_s22 = sphi %s1186_s22, %s1537_s22   ;;  %s1126_s21 = sphi %s1184_s21, %s1536_s21  }
   0x6   : > { %s1209_s27 = sadd.s32 1, %s1138_s24   ;;  %s29_s28 = sadd.s32 1, %s1134_s23 }
   0x7   : > { %s26_s29 = ssub.s32 %s1138_s24, %s1209_s27  ;;  %p36_p0 = scmp.ne.s32.totalorder %s1134_s23, %s1130_s22 }
   0x8   : > { %p27_p1 = scmp.eq.s32.totalorder %s26_s29, 0  ;;  %p37_p2 = scmp.eq.s32.totalorder %s1138_s24, 0 }
   0x9   : > { %p42_p3 = scmp.ne.s32.totalorder %s1130_s22, %s1126_s21  ;;  %p43_p4 = scmp.eq.s32.totalorder %s1205_s25, 0 }
   0xa   : > { %s1221_s30 = scalar_select %p27_p1, %s1134_s23, %s29_s28  }
   0xb   : > { %p1223_p5 = por %p37_p2, %p36_p0  ;;  %p1227_p6 = por %p43_p4, %p42_p3 }
   0xc   : > { %p171_p7 = scmp.eq.s32.totalorder %s1205_s25, 1  ;;  %p177_p8 = scmp.eq.s32.totalorder %s863_s26, 1 }
   0xd   : > { %s1528_s8 = scalar_select %p1227_p6, 1, 0 }
   0xe   : > { %p963_p10 = scmp.lt.s32.totalorder %s1138_s24, 2  ;;  %p1234_p11 = por %p171_p7, %p36_p0 }
   0xf   : > { %p1238_p12 = por %p177_p8, %p42_p3  ;;  %s212_s11 = sand.u32 1, %s1134_s23  }
  0x10   : > { %s1529_s9 = scalar_select %p1234_p11, 1, 0 }
  0x11   : > { %s1530_s10 = scalar_select %p1238_p12, 1, 0 }
  0x12   : > { %s898_s12 = sshll.u32 %s1138_s24, 11  ;;  %s866_s13 = sshll.u32 %s212_s11, 7 }
  0x13   : > { %s1247_s16 = scalar_lea.hbm %s1518_s0, %s898_s12  ;;  %s216_s17 = scalar_lea.vmem [#allocation2], %s866_s13 }
  0x14   : > { %s223_s18 = sshll.u32 %s216_s17, 4  ;;  %p1251_p13 = pnand %p963_p10, %p1223_p5  ;;  %s1255_s18 = int_to_ptr.vmem [resolvable:$true] %s223_s18 }
  0x15   : > { %s1257_s20 = scalar_lea.sflag [#allocation3], %s212_s11  ;;  %s1046_s26 = scalar_lea.hbm %s1247_s16, 2048 }
  0x16   : > { %p1047_p0 = scmp.ne.s32.totalorder %s1247_s16, %s1046_s26  ;;  %p1048_p1 = pneg %p1251_p13 }
  0x17   : > { %s1051_s12 = scalar_lea.hbm %s1518_s0, 4096  ;;  %p1052_p4 = scmp.lt.s32.totalorder %s1247_s16, %s1518_s0 }
  0x18   : > { %p1049_p2 = pnand %p1048_p1, %p1047_p0  ;;  %p1053_p5 = scmp.lt.s32.totalorder %s1051_s12, %s1046_s26 }
  0x1a   : > { %p1050_p3 = pneg %p1049_p2  ;;  %p1054_p7 = por %p1053_p5, %p1052_p4 }
  0x1c   : > { %p1055_p8 = pnand %p1054_p7, %p1050_p3 }
  0x1e   : > { %1058 = shalt.err (!%p1055_p8)
}
  0x1f   : > { %s1059_s11 = scalar_lea.vmem %s1255_s18, 2048  ;;  %s1140_s14 = smov [#allocation2]  }
  0x20   : > { %p1060_p10 = scmp.ne.s32.totalorder %s1255_s18, %s1059_s11  ;;  %s1064_s15 = sshll.u32 %s1140_s14, 4  ;;  %s1065_s15 = int_to_ptr.vmem [resolvable:$false] %s1064_s15 }
  0x21   : > { %s1066_s17 = scalar_lea.vmem %s1065_s15, 4096  ;;  %p1067_p2 = scmp.lt.s32.totalorder %s1255_s18, %s1065_s15 }
  0x22   : > { %p1062_p9 = pnand %p1060_p10, %p1048_p1  ;;  %p1068_p12 = scmp.lt.s32.totalorder %s1066_s17, %s1059_s11 }
  0x24   : > { %p1063_p0 = pneg %p1062_p9  ;;  %p1069_p11 = por %p1068_p12, %p1067_p2 }
  0x26   : > { %p1070_p6 = pnand %p1069_p11, %p1063_p0 }
  0x28   : > { %1073 = shalt.err (!%p1070_p6)
}
  0x29   : > { %s1141_s26 = smov 256   ;;  %s1142_s28 = smov 16  }
  0x2a   : > { %958 = dma.hbm_to_vmem [thread:$0]  (!%p1251_p13), %s1247_s16, 2048, %s1255_s18, %s1257_s20, %s1141_s26, %s1141_s26, %s1142_s28  }
  0x2b   : > { %p869_p9 = scmp.ge.s32.totalorder %s1138_s24, 1  ;;  %p231_p1 = scmp.lt.s32.totalorder %s1138_s24, 3 }
  0x2d   : > { %p232_p3 = pnand %p869_p9, %p231_p1 }
  0x2e   : > { %s1281_s29 = sand.u32 (!%p232_p3), 1, %s1130_s22   ;;  %p1532_p6 = scmp.ne.s32.totalorder (!%p232_p3), %s1528_s8, 0 }
  0x2f   : > { %235 = sbr.rel (%p232_p3) target bundleno = 805 (0x325), region = 44  ;;  %s870_s12 = sshll.u32 (!%p232_p3), %s1281_s29, 7 }
  0x30   : > { %s238_s7 = scalar_lea.sflag (!%p232_p3), [#allocation3], %s1281_s29  ;;  %s241_s13 = scalar_lea.vmem (!%p232_p3), [#allocation2], %s870_s12 }
  0x34   : > { %1117 = dma.done.wait (%p1532_p6), %s238_s7, 2048  }
  0x35   : > { %1119 = vsyncadd (%p1532_p6), %s238_s7, 4294965248  ;;  %v1291_v0 = vld [vmem:[%s241_s13 + $0x70] sm:$0xff]  ;;  %v1293_v1 = vld [vmem:[%s241_s13 + $0x78] sm:$0xff]  ;;  %v1143_v24 = vmov 0.0   ;;  %vm1144_vm0 = vmmov 0   ;;  %vm320_vm1 = vcmask 523264  }
  0x36   : > { %v1295_v2 = vld [vmem:[%s241_s13 + $0x60] sm:$0xff]  ;;  %v307_v3 = vadd.f32 %v1293_v1, %v1291_v0  ;;  %v1299_v4 = vld [vmem:[%s241_s13 + $0x68] sm:$0xff]  ;;  %v1301_v5 = vld [vmem:[%s241_s13 + $0x50] sm:$0xff]  ;;  %918 = vmatprep.subr.mxu0 %v1143_v24  ;;  %934 = vmatprep.mubr.msk.f32.mxu0 %vm1144_vm0, %v1143_v24  ;;  %vm411_vm2 = vcmask 31744   ;;  %vm436_vm3 = vcmask 1043456   ;;  %v1145_v56 = vmov 0  }
  0x37   : > { %v1303_v6 = vld [vmem:[%s241_s13 + $0x58] sm:$0xff]  ;;  %v1307_v8 = vld [vmem:[%s241_s13 + $0x40] sm:$0xff]  ;;  %v1309_v9 = vld [vmem:[%s241_s13 + $0x48] sm:$0xff]  ;;  %v304_v10 = vadd.f32 %v1299_v4, %v1295_v2  ;;  %1005 = vset.pattern.permute.xlu1 %v1145_v56  ;;  %1004 = vset.pattern.permute.xlu0 %v1145_v56  ;;  %p1533_p12 = scmp.ne.s32.totalorder %s1529_s9, 0  ;;  %s1146_s11 = smov [#allocation5]  }
  0x38   : > { %v301_v7 = vadd.f32 %v1303_v6, %v1301_v5  ;;  %308 = vadd.xlane.f32.xlu0 %v307_v3  ;;  %v298_v11 = vadd.f32 %v1309_v9, %v1307_v8  ;;  %v1315_v12 = vld [vmem:[%s241_s13 + $0x30] sm:$0xff]  ;;  %v1317_v13 = vld [vmem:[%s241_s13 + $0x38] sm:$0xff]  ;;  %v1319_v14 = vld [vmem:[%s241_s13 + $0x20] sm:$0xff]  ;;  %s1078_s14 = sshll.u32 %s1146_s11, 4  ;;  %s1079_s14 = int_to_ptr.vmem [resolvable:$false] %s1078_s14 }
  0x39   : > { %v1321_v15 = vld [vmem:[%s241_s13 + $0x28] sm:$0xff]  ;;  %v295_v16 = vadd.f32 %v1317_v13, %v1315_v12  ;;  %v1327_v18 = vld [vmem:[%s241_s13 + $0x10] sm:$0xff]  ;;  %v1329_v19 = vld [vmem:[%s241_s13 + $0x18] sm:$0xff]  ;;  %s1080_s15 = scalar_lea.vmem %s1079_s14, 4096 }
  0x3a   : > { %302 = vadd.xlane.f32.xlu1 %v301_v7  ;;  %v292_v17 = vadd.f32 %v1321_v15, %v1319_v14  ;;  %v1331_v20 = vld [vmem:[%s241_s13] sm:$0xff]  ;;  %v1333_v21 = vld [vmem:[%s241_s13 + $0x8] sm:$0xff]  ;;  %v289_v22 = vadd.f32 %v1329_v19, %v1327_v18  ;;  %v397_v49 = vld [vmem:[%s1521_s3 + $0x10] sm:$0xff]  ;;  %s1436_s13 = scalar_lea.vmem [#allocation5], %s870_s12  ;;  %s899_s12 = sshll.u32 %s1205_s25, 11 }
  0x3b   : > { %v286_v23 = vadd.f32 %v1333_v21, %v1331_v20  ;;  %v318_v41 = vld [vmem:[%s1519_s1] sm:$0xf]  ;;  %v396_v48 = vld [vmem:[%s1521_s3 + $0x8] sm:$0xff]  ;;  %v398_v50 = vld [vmem:[%s1521_s3 + $0x18] sm:$0xff]  ;;  %s790_s8 = sshll.u32 %s1436_s13, 4  ;;  %s1469_s19 = scalar_lea.hbm %s1524_s6, %s899_s12  ;;  %s1471_s8 = int_to_ptr.vmem [resolvable:$true] %s790_s8 }
  0x3c   : > { %305 = vadd.xlane.f32.xlu0 %v304_v10  ;;  %v395_v42 = vld [vmem:[%s1521_s3] sm:$0xff]  ;;  %v400_v52 = vld [vmem:[%s1521_s3 + $0x28] sm:$0xff]  ;;  %v401_v53 = vld [vmem:[%s1521_s3 + $0x30] sm:$0xff]  ;;  %s777_s25 = scalar_lea.sflag [#allocation4], %s1281_s29  ;;  %s1074_s20 = scalar_lea.vmem %s1471_s8, 2048 }
  0x3d   : > { %939 = vmatprep.mubr.msk.f32.mxu1 %vm411_vm2, %v395_v42  ;;  %v319_v43 = vld [vmem:[%s1520_s2] sm:$0xf]  ;;  %v402_v54 = vld [vmem:[%s1521_s3 + $0x38] sm:$0xff]  ;;  %v404_v57 = vld [vmem:[%s1522_s4 + $0x8] sm:$0xff]  ;;  %p1075_p11 = scmp.ne.s32.totalorder %s1471_s8, %s1074_s20  ;;  %p1081_p5 = scmp.lt.s32.totalorder %s1471_s8, %s1079_s14 }
  0x3e   : > { %299 = vadd.xlane.f32.xlu1 %v298_v11  ;;  %v399_v51 = vld [vmem:[%s1521_s3 + $0x20] sm:$0xff]  ;;  %v406_v62 = vld [vmem:[%s1522_s4 + $0x18] sm:$0xff]  ;;  %v405_v10 = vld [vmem:[%s1522_s4 + $0x10] sm:$0xff]  ;;  %p1082_p7 = scmp.lt.s32.totalorder %s1080_s15, %s1074_s20 }
  0x3f   : > { %v593_v55 = vld [vmem:[%s1523_s5] sm:$0x1]  ;;  %p1076_p13 = pnand %p1075_p11, %p1533_p12 }
  0x40   : > { %296 = vadd.xlane.f32.xlu0 %v295_v16  ;;  %v403_v59 = vld [vmem:[%s1522_s4] sm:$0xff]  ;;  %p1083_p8 = por %p1082_p7, %p1081_p5 }
  0x41   : > { %p1077_p4 = pneg %p1076_p13 }
  0x42   : > { %293 = vadd.xlane.f32.xlu1 %v292_v17 }
  0x43   : > { %p1084_p10 = pnand %p1083_p8, %p1077_p4 }
  0x44   : > { %290 = vadd.xlane.f32.xlu0 %v289_v22  ;;  %v408_v22 = vld [vmem:[%s1522_s4 + $0x28] sm:$0xff] }
  0x46   : > { %287 = vadd.xlane.f32.xlu1 %v286_v23 }
  0xc1   : > { %v309_v25 = vpop.xlane.xlu0 %308 }
  0xc2   : > { %v317_v26 = vmul.f32 0.00390625, %v309_v25 }
  0xc3   : > { %v303_v27 = vpop.xlane.xlu1 %302 }
  0xc4   : > { %919 = vmatpush3.msra.mxu0 %v317_v26  ;;  %v315_v31 = vmul.f32 0.00390625, %v303_v27  ;;  %v407_v26 = vld [vmem:[%s1522_s4 + $0x20] sm:$0xff] }
  0xc5   : > { %v306_v28 = vpop.xlane.xlu0 %305  ;;  %920 = vmatprep.subr.mxu0 %v1143_v24 }
  0xc6   : > { %v316_v29 = vmul.f32 0.00390625, %v306_v28 }
  0xc7   : > { %v300_v30 = vpop.xlane.xlu1 %299 }
  0xc8   : > { %921 = vmatpush3.msra.mxu0 %v316_v29  ;;  %v314_v32 = vmul.f32 0.00390625, %v300_v30 }
  0xc9   : > { %922 = vmatprep.subr.mxu0 %v1143_v24  ;;  %v297_v33 = vpop.xlane.xlu0 %296 }
  0xca   : > { %923 = vmatpush3.msra.mxu0 %v315_v31  ;;  %v313_v34 = vmul.f32 0.00390625, %v297_v33  ;;  %v409_v33 = vld [vmem:[%s1522_s4 + $0x30] sm:$0xff] }
  0xcb   : > { %v294_v35 = vpop.xlane.xlu1 %293  ;;  %924 = vmatprep.subr.mxu0 %v1143_v24 }
  0xcc   : > { %925 = vmatpush3.msra.mxu0 %v314_v32  ;;  %v312_v36 = vmul.f32 0.00390625, %v294_v35  ;;  %v410_v35 = vld [vmem:[%s1522_s4 + $0x38] sm:$0xff] }
  0xcd   : > { %926 = vmatprep.subr.mxu0 %v1143_v24  ;;  %v291_v37 = vpop.xlane.xlu0 %290 }
  0xce   : > { %927 = vmatpush3.msra.mxu0 %v313_v34  ;;  %v311_v38 = vmul.f32 0.00390625, %v291_v37 }
  0xcf   : > { %v288_v39 = vpop.xlane.xlu1 %287  ;;  %928 = vmatprep.subr.mxu0 %v1143_v24 }
  0xd0   : > { %929 = vmatpush3.msra.mxu0 %v312_v36  ;;  %v310_v40 = vmul.f32 0.00390625, %v288_v39 }
  0xd1   : > { %930 = vmatprep.subr.mxu0 %v1143_v24 }
  0xd2   : > { %931 = vmatpush3.msra.mxu0 %v311_v38 }
  0xd3   : > { %932 = vmatprep.subr.mxu0 %v1143_v24 }
  0xd4   : > { %933 = vmatpush3.msra.mxu0 %v310_v40 }
  0xd5   : > { %935 = vmatmul.mubr.msk.f32.vlgmr.msra.gmra.mxu0 %vm320_vm1, %v318_v41 }
 0x195   : > { %v390_v44 = vpop.f32.mrf.mxu0 }
 0x196   : > { %v391_v45 = vadd.f32 %v390_v44, %v319_v43 }
 0x197   : > { %v936_v46 = vpop.f32.mrf.mxu0 }
 0x198   : > { %v394_v47 = vmax.f32 %v391_v45, 0.0 }
 0x19a   : > { %937 = vmatprep.subr.msk.mxu1 %vm436_vm3, %v394_v47 }
 0x19b   : > { %938 = vmatpush3.msk.msra.mxu1 %vm436_vm3, %v394_v47 }
 0x19c   : > { %940 = vmatmul.mubr.msk.f32.vlgmr.msra.gmra.mxu1 %vm411_vm2, %v396_v48  ;;  %613 = vmatprep.subr.mxu1 %v1293_v1 }
 0x19d   : > { %942 = vmatprep.mubr.msk.f32.mxu1 %vm411_vm2, %v397_v49  ;;  %614 = vmatpush1.msra.mxu1 %v1291_v0 }
 0x19e   : > { %615 = vmatprep.subr.mxu1 %v1299_v4 }
 0x19f   : > { %616 = vmatpush1.msra.mxu1 %v1295_v2 }
 0x1a0   : > { %943 = vmatmul.mubr.msk.f32.gmra.mxu1 %vm411_vm2, %v398_v50  ;;  %617 = vmatprep.subr.mxu1 %v1303_v6 }
 0x1a1   : > { %945 = vmatprep.mubr.msk.f32.mxu1 %vm411_vm2, %v399_v51  ;;  %618 = vmatpush1.msra.mxu1 %v1301_v5 }
 0x1a2   : > { %619 = vmatprep.subr.mxu1 %v1309_v9 }
 0x1a3   : > { %620 = vmatpush1.msra.mxu1 %v1307_v8 }
 0x1a4   : > { %946 = vmatmul.mubr.msk.f32.gmra.mxu1 %vm411_vm2, %v400_v52  ;;  %621 = vmatprep.subr.mxu1 %v1317_v13 }
 0x1a5   : > { %948 = vmatprep.mubr.msk.f32.mxu1 %vm411_vm2, %v401_v53  ;;  %622 = vmatpush1.msra.mxu1 %v1315_v12 }
 0x1a6   : > { %623 = vmatprep.subr.mxu1 %v1321_v15 }
 0x1a7   : > { %624 = vmatpush1.msra.mxu1 %v1319_v14 }
 0x1a8   : > { %949 = vmatmul.mubr.msk.f32.gmra.mxu1 %vm411_vm2, %v402_v54  ;;  %625 = vmatprep.subr.mxu1 %v1329_v19 }
 0x1a9   : > { %626 = vmatpush1.msra.mxu1 %v1327_v18  ;;  %661 = vmatprep.mubr.f32.mxu1 %v1143_v24 }
 0x1aa   : > { %627 = vmatprep.subr.mxu1 %v1333_v21 }
 0x1ab   : > { %628 = vmatpush1.msra.mxu1 %v1331_v20 }
 0x1ac   : > { %890 = vmatmul.mubr.msk.f32.vlgmr.msra.gmra.mxu1 %vm320_vm1, %v593_v55 }
 0x25c   : > { %v941_v58 = vpop.f32.mrf.mxu1 }
 0x25d   : > { %v512_v60 = vadd.f32 %v941_v58, %v404_v57 }
 0x25e   : > { %v506_v61 = vpop.f32.mrf.mxu1 }
 0x25f   : > { %v883_v63 = vmul.f32 -1.442695, %v512_v60  ;;  %v507_v3 = vadd.f32 %v506_v61, %v403_v59 }
 0x260   : > { %v944_v7 = vpop.f32.mrf.mxu1 }
 0x261   : > { %1006 = vpow2.f32 %v883_v63  ;;  %v882_v11 = vmul.f32 -1.442695, %v507_v3  ;;  %v522_v16 = vadd.f32 %v944_v7, %v406_v62 }
 0x262   : > { %v516_v17 = vpop.f32.mrf.mxu1 }
 0x263   : > { %1008 = vpow2.f32 %v882_v11  ;;  %v885_v23 = vmul.f32 -1.442695, %v522_v16  ;;  %v517_v24 = vadd.f32 %v516_v17, %v405_v10 }
 0x264   : > { %v947_v25 = vpop.f32.mrf.mxu1 }
 0x265   : > { %1010 = vpow2.f32 %v885_v23  ;;  %v884_v27 = vmul.f32 -1.442695, %v517_v24  ;;  %v532_v28 = vadd.f32 %v947_v25, %v408_v22  ;;  %v680_v25 = vlaneseq }
 0x266   : > { %v526_v29 = vpop.f32.mrf.mxu1 }
 0x267   : > { %1012 = vpow2.f32 %v884_v27  ;;  %v887_v30 = vmul.f32 -1.442695, %v532_v28  ;;  %v527_v31 = vadd.f32 %v526_v29, %v407_v26  ;;  %v681_v26 = vshrl.u32 %v680_v25, 7 }
 0x268   : > { %v950_v32 = vpop.f32.mrf.mxu1 }
 0x269   : > { %1014 = vpow2.f32 %v887_v30  ;;  %v886_v34 = vmul.f32 -1.442695, %v527_v31  ;;  %v542_v38 = vadd.f32 %v950_v32, %v410_v35  ;;  %v682_v28 = vsub.s32 0, %v681_v26 }
 0x26a   : > { %v536_v36 = vpop.f32.mrf.mxu1 }
 0x26b   : > { %v537_v37 = vadd.f32 %v536_v36, %v409_v33  ;;  %1016 = vpow2.f32 %v886_v34  ;;  %v889_v43 = vmul.f32 -1.442695, %v542_v38 }
 0x26c   : > { %v663_v7 = vpop.f32.mrf.mxu1 }
 0x26d   : > { %v888_v39 = vmul.f32 -1.442695, %v537_v37  ;;  %v891_v11 = vmul.f32 -1.442695, %v663_v7 }
 0x26e   : > { %v1007_v40 = vpop.eup %1006  ;;  %v665_v10 = vpop.f32.mrf.mxu1 }
 0x26f   : > { %v570_v41 = vadd.f32 1.0, %v1007_v40  ;;  %1018 = vpow2.f32 %v888_v39  ;;  %v892_v16 = vmul.f32 -1.442695, %v665_v10 }
 0x270   : > { %v1009_v42 = vpop.eup %1008 }
 0x271   : > { %1020 = vrcp.f32 %v570_v41  ;;  %v569_v44 = vadd.f32 1.0, %v1009_v42 }
 0x272   : > { %v1011_v45 = vpop.eup %1010 }
 0x273   : > { %1022 = vrcp.f32 %v569_v44  ;;  %v572_v46 = vadd.f32 1.0, %v1011_v45 }
 0x274   : > { %v1013_v47 = vpop.eup %1012  ;;  %1024 = vpow2.f32 %v889_v43 }
 0x275   : > { %1026 = vrcp.f32 %v572_v46  ;;  %v571_v48 = vadd.f32 1.0, %v1013_v47 }
 0x276   : > { %v1015_v49 = vpop.eup %1014 }
 0x277   : > { %v574_v50 = vadd.f32 1.0, %v1015_v49  ;;  %1028 = vrcp.f32 %v571_v48 }
 0x278   : > { %v1017_v51 = vpop.eup %1016 }
 0x279   : > { %1030 = vrcp.f32 %v574_v50  ;;  %v573_v53 = vadd.f32 1.0, %v1017_v51 }
 0x27b   : > { %1032 = vrcp.f32 %v573_v53 }
 0x27c   : > { %v1019_v52 = vpop.eup %1018 }
 0x27d   : > { %v575_v57 = vadd.f32 1.0, %v1019_v52 }
 0x27e   : > { %v1021_v54 = vpop.eup %1020 }
 0x27f   : > { %695 = vperm.xlu1 %1005, %v1021_v54   ;;  %1034 = vrcp.f32 %v575_v57 }
 0x280   : > { %v1023_v55 = vpop.eup %1022 }
 0x281   : > { %v1025_v56 = vpop.eup %1024  ;;  %690 = vperm.xlu0 %1004, %v1023_v55  }
 0x282   : > { %v1027_v58 = vpop.eup %1026  ;;  %v576_v59 = vadd.f32 1.0, %v1025_v56 }
 0x283   : > { %705 = vperm.xlu1 %1005, %v1027_v58  }
 0x284   : > { %v1029_v60 = vpop.eup %1028  ;;  %1036 = vrcp.f32 %v576_v59 }
 0x285   : > { %1038 = vpow2.f32 %v891_v11 }
 0x286   : > { %v1031_v61 = vpop.eup %1030  ;;  %1040 = vpow2.f32 %v892_v16 }
 0x287   : > { %700 = vperm.xlu1 %1005, %v1029_v60  }
 0x288   : > { %v1033_v62 = vpop.eup %1032 }
 0x28b   : > { %715 = vperm.xlu1 %1005, %v1031_v61  }
 0x28c   : > { %v1035_v63 = vpop.eup %1034 }
 0x28f   : > { %710 = vperm.xlu1 %1005, %v1033_v62  }
 0x291   : > { %v1037_v3 = vpop.eup %1036 }
 0x292   : > { %v1039_v17 = vpop.eup %1038 }
 0x293   : > { %720 = vperm.xlu1 %1005, %v1035_v63   ;;  %v1041_v22 = vpop.eup %1040  ;;  %v674_v23 = vadd.f32 1.0, %v1039_v17 }
 0x294   : > { %v675_v24 = vadd.f32 1.0, %v1041_v22 }
 0x295   : > { %1042 = vrcp.f32 %v674_v23 }
 0x296   : > { %1044 = vrcp.f32 %v675_v24 }
 0x297   : > { %725 = vperm.xlu1 %1005, %v1037_v3  }
 0x2a2   : > { %v1043_v27 = vpop.eup %1042 }
 0x2a3   : > { %v1045_v29 = vpop.eup %1044  ;;  %v683_v30 = vrot.slane %v1043_v27, %v682_v28 }
 0x2a4   : > { %v687_v31 = vrot.slane %v1045_v29, %v682_v28 }
 0x2fa   : > { %v696_v32 = vpop.permute.xlu1 %695 }
 0x2fb   : > { %v730_v33 = vadd.f32 %v696_v32, %v683_v30  ;;  %v731_v34 = vadd.f32 %v696_v32, %v687_v31 }
 0x2fc   : > { %v691_v35 = vpop.permute.xlu0 %690 }
 0x2fd   : > { %v746_v36 = vmul.f32 %v730_v33, %v1327_v18  ;;  %v747_v37 = vmul.f32 %v731_v34, %v1329_v19  ;;  %v728_v38 = vadd.f32 %v691_v35, %v683_v30  ;;  %v729_v39 = vadd.f32 %v691_v35, %v687_v31 }
 0x2fe   : > { %v706_v40 = vpop.permute.xlu1 %705 }
 0x2ff   : > { %762 = vst [vmem:[%s1436_s13 + $0x10] sm:$0xff] %v746_v36  ;;  %763 = vst [vmem:[%s1436_s13 + $0x18] sm:$0xff] %v747_v37  ;;  %v744_v41 = vmul.f32 %v728_v38, %v1331_v20  ;;  %v745_v18 = vmul.f32 %v729_v39, %v1333_v21  ;;  %v734_v19 = vadd.f32 %v706_v40, %v683_v30 }
 0x300   : > { %v735_v42 = vadd.f32 %v706_v40, %v687_v31 }
 0x301   : > { %760 = vst [vmem:[%s1436_s13] sm:$0xff] %v744_v41  ;;  %761 = vst [vmem:[%s1436_s13 + $0x8] sm:$0xff] %v745_v18  ;;  %v750_v43 = vmul.f32 %v734_v19, %v1315_v12 }
 0x302   : > { %v751_v44 = vmul.f32 %v735_v42, %v1317_v13  ;;  %v701_v45 = vpop.permute.xlu1 %700 }
 0x303   : > { %766 = vst [vmem:[%s1436_s13 + $0x30] sm:$0xff] %v750_v43  ;;  %v732_v46 = vadd.f32 %v701_v45, %v683_v30  ;;  %v733_v47 = vadd.f32 %v701_v45, %v687_v31 }
 0x304   : > { %767 = vst [vmem:[%s1436_s13 + $0x38] sm:$0xff] %v751_v44 }
 0x305   : > { %v748_v20 = vmul.f32 %v732_v46, %v1319_v14  ;;  %v749_v21 = vmul.f32 %v733_v47, %v1321_v15 }
 0x306   : > { %v716_v48 = vpop.permute.xlu1 %715 }
 0x307   : > { %764 = vst [vmem:[%s1436_s13 + $0x20] sm:$0xff] %v748_v20  ;;  %765 = vst [vmem:[%s1436_s13 + $0x28] sm:$0xff] %v749_v21  ;;  %v738_v49 = vadd.f32 %v716_v48, %v683_v30  ;;  %v739_v12 = vadd.f32 %v716_v48, %v687_v31 }
 0x309   : > { %v754_v13 = vmul.f32 %v738_v49, %v1301_v5  ;;  %v755_v50 = vmul.f32 %v739_v12, %v1303_v6 }
 0x30a   : > { %v711_v51 = vpop.permute.xlu1 %710 }
 0x30b   : > { %770 = vst [vmem:[%s1436_s13 + $0x50] sm:$0xff] %v754_v13  ;;  %771 = vst [vmem:[%s1436_s13 + $0x58] sm:$0xff] %v755_v50  ;;  %v736_v14 = vadd.f32 %v711_v51, %v683_v30  ;;  %v737_v15 = vadd.f32 %v711_v51, %v687_v31 }
 0x30d   : > { %v752_v52 = vmul.f32 %v736_v14, %v1307_v8  ;;  %v753_v53 = vmul.f32 %v737_v15, %v1309_v9 }
 0x30e   : > { %v721_v54 = vpop.permute.xlu1 %720 }
 0x30f   : > { %768 = vst [vmem:[%s1436_s13 + $0x40] sm:$0xff] %v752_v52  ;;  %769 = vst [vmem:[%s1436_s13 + $0x48] sm:$0xff] %v753_v53  ;;  %v740_v5 = vadd.f32 %v721_v54, %v683_v30  ;;  %v741_v55 = vadd.f32 %v721_v54, %v687_v31 }
 0x311   : > { %v756_v6 = vmul.f32 %v740_v5, %v1295_v2  ;;  %v757_v56 = vmul.f32 %v741_v55, %v1299_v4 }
 0x312   : > { %v726_v57 = vpop.permute.xlu1 %725 }
 0x313   : > { %772 = vst [vmem:[%s1436_s13 + $0x60] sm:$0xff] %v756_v6  ;;  %773 = vst [vmem:[%s1436_s13 + $0x68] sm:$0xff] %v757_v56  ;;  %v742_v8 = vadd.f32 %v726_v57, %v683_v30  ;;  %v743_v9 = vadd.f32 %v726_v57, %v687_v31 }
 0x315   : > { %v758_v2 = vmul.f32 %v742_v8, %v1291_v0  ;;  %v759_v4 = vmul.f32 %v743_v9, %v1293_v1 }
 0x317   : > { %774 = vst [vmem:[%s1436_s13 + $0x70] sm:$0xff] %v758_v2  ;;  %775 = vst [vmem:[%s1436_s13 + $0x78] sm:$0xff] %v759_v4 }
 0x318   : > { %1087 = shalt.err (!%p1084_p10)
}
 0x319   : > { %s1088_s17 = scalar_lea.hbm %s1469_s19, 2048  ;;  %s1092_s7 = scalar_lea.hbm %s1524_s6, 4096 }
 0x31a   : > { %p1089_p0 = scmp.ne.s32.totalorder %s1469_s19, %s1088_s17  ;;  %p1093_p1 = scmp.lt.s32.totalorder %s1469_s19, %s1524_s6 }
 0x31b   : > { %p1094_p3 = scmp.lt.s32.totalorder %s1092_s7, %s1088_s17 }
 0x31c   : > { %p1090_p2 = pnand %p1089_p0, %p1533_p12 }
 0x31d   : > { %p1095_p6 = por %p1094_p3, %p1093_p1 }
 0x31e   : > { %p1091_p9 = pneg %p1090_p2 }
 0x320   : > { %p1096_p11 = pnand %p1095_p6, %p1091_p9 }
 0x322   : > { %1099 = shalt.err (!%p1096_p11)
}
 0x323   : > { %s1147_s16 = smov 256   ;;  %s1148_s18 = smov 16  }
 0x324   : > { %953 = dma.vmem_to_hbm [thread:$0]  (%p1533_p12), %s1471_s8, 2048, %s1469_s19, %s777_s25, %s1147_s16, %s1147_s16, %s1148_s18  }
 0x325 PF: > { %s805_s20 = sand.u32 1, %s1126_s21   ;;  %p1534_p13 = scmp.ne.s32.totalorder %s1530_s10, 0 }
 0x326   : > { %p1535_p4 = scmp.ge.s32.totalorder %s1138_s24, 2  ;;  %s806_s11 = scalar_lea.sflag [#allocation4], %s805_s20 }
 0x328   : > { %p960_p5 = pnand %p1535_p4, %p1534_p13 }
 0x32a   : > { %p961_p7 = pneg %p960_p5 }
 0x32c   : > { %1121 = dma.done.wait (%p961_p7), %s806_s11, 2048  }
 0x32d   : > { %1123 = vsyncadd (%p961_p7), %s806_s11, 4294965248  ;;  %p19_p8 = scmp.ge.s32.totalorder %s1209_s27, 4   ;;  %s1536_s21 = smov %s1130_s22 }
 0x32e   : > { %s1537_s22 = smov %s1134_s23  ;;  %s1538_s23 = smov %s1221_s30 }
 0x32f   : > { %s1539_s24 = smov %s1209_s27  ;;  %21 = sbr.rel (!%p19_p8) target bundleno = 5 (0x5), region = 89 }
 0x334   :  { %811 = vsyncpa [#allocation3], 1 }
 0x335   :  { %813 = vsyncpa [#allocation3 + $0x1], 1 }
 0x336   :  { %814 = vsyncpa [#allocation4], 1 }
 0x337   :  { %816 = vsyncpa [#allocation4 + $0x1], 1 }

</bundles_post_ra>
